<compile_context>
chip_gen: v5e
topology: v5e:2x2
jax: 0.10.0
libtpu: 0.0.40
codegen_flags: <defaults>
</compile_context>

<pallas_src>
import functools

import jax
import jax.numpy as jnp
from jax import lax
from jax.experimental import pallas as pl
from jax.experimental.pallas import tpu as pltpu


def _round_up(x, m):
    return (x + m - 1) // m * m


def _vq_kernel(zt_ref, emb_ref, esq_ref, zq_ref, idx_ref, sqr_ref):
    """Processes one tile of `tile` columns (spatial positions).

    zt_ref  : (e_dim, tile)    f32  encoder outputs (transposed, lane-dense)
    emb_ref : (n_e_pad, e_dim) f32  codebook (grid-invariant; pad rows are 0)
    esq_ref : (n_e_pad, 1)     f32  ||e_k||^2 (pad entries = 1e30, never argmin)
    zq_ref  : (e_dim, tile)    f32  quantized columns
    idx_ref : (1, tile)        i32  argmin code index per column
    sqr_ref : (1, tile)        f32  per-column sum((z_q - z)^2)  (loss partial)
    """
    zt = zt_ref[...]                                   # (e_dim, tile)
    emb = emb_ref[...]                                 # (n_e_pad, e_dim)
    n_e_pad = emb.shape[0]

    # <e_k, z_n>: contract on e_dim -> (n_e_pad, tile), no transposes in-kernel.
    edotz = lax.dot_general(emb, zt, (((1,), (0,)), ((), ())),
                            preferred_element_type=jnp.float32)

    # argmin_k ||z - e_k||^2 == argmin_k (||e_k||^2 - 2<e_k, z>)  (||z||^2 dropped)
    score = esq_ref[...] - 2.0 * edotz                 # (n_e_pad, tile)
    min_s = jnp.min(score, axis=0, keepdims=True)      # (1, tile)
    row = lax.broadcasted_iota(jnp.int32, score.shape, 0)
    idx = jnp.min(jnp.where(score == min_s, row, n_e_pad),
                  axis=0, keepdims=True)               # first occurrence, (1, tile)

    enc = (row == idx).astype(jnp.float32)             # (n_e_pad, tile) one-hot cols
    # z_q^T = emb^T @ enc : contract on n_e_pad -> (e_dim, tile)
    zq = lax.dot_general(emb, enc, (((0,), (0,)), ((), ())),
                         preferred_element_type=jnp.float32)

    diff = zq - zt
    zq_ref[...] = zq
    idx_ref[...] = idx
    sqr_ref[...] = jnp.sum(diff * diff, axis=0, keepdims=True)


def _vmem_estimate_bytes(tile, e_dim, n_e_pad):
    """Rough per-step VMEM footprint (double-buffered I/O + resident codebook)."""
    io = 2 * 4 * (2 * tile * e_dim + 4 * tile)          # z in, zq out, idx, sq rows
    codebook = 2 * 4 * (n_e_pad * e_dim + n_e_pad)      # emb + e_sq
    interm = 3 * 4 * tile * n_e_pad                     # edotz/score/one-hot temps
    return io + codebook + interm


# TODO(synk): forward values only; the straight-through / stop-gradient backward
# semantics of the PyTorch module would need a jax.custom_vjp wrapper.
@functools.partial(jax.jit, static_argnames=("beta", "tile"))
def vector_quantizer(z, emb, beta=0.25, tile=512):
    """Forward pass of VectorQuantizer.

    z   : (B, C, H, W) float32, C == e_dim
    emb : (n_e, e_dim) float32 codebook
    returns (loss, z_q (B,C,H,W), perplexity, min_encodings (N,n_e) f32,
             min_encoding_indices (N,1) int32)
    """
    B, C, H, W = z.shape
    e_dim = C
    n_e = emb.shape[0]

    z = z.astype(jnp.float32)
    emb = emb.astype(jnp.float32)

    # glue: NCHW -> (e_dim, N) with N ordered as (b, h, w); N is the lane axis.
    z_t = jnp.transpose(z, (1, 0, 2, 3)).reshape(e_dim, -1)
    N = z_t.shape[1]

    # Pad the codebook axis to a multiple of 8 (sublane); pad codes get a huge
    # squared norm so they can never win the argmin.
    n_e_pad = _round_up(n_e, 8)
    emb_p = jnp.pad(emb, ((0, n_e_pad - n_e), (0, 0)))
    e_sq = jnp.sum(emb * emb, axis=1)
    e_sq_p = jnp.pad(e_sq, (0, n_e_pad - n_e), constant_values=1e30)[:, None]

    # Column tile: multiple of 128 (lane-dense), big enough to amortize per-step
    # overhead, small enough to fit VMEM (v7x: 64 MiB physical / 32 MiB scoped).
    vmem_cap = 40 * 1024 * 1024
    t = _round_up(min(max(tile, 128), _round_up(max(N, 1), 128)), 128)
    while t > 128 and _vmem_estimate_bytes(t, e_dim, n_e_pad) > vmem_cap:
        t = max(128, _round_up(t // 2, 128))

    n_pad = _round_up(N, t)
    if n_pad != N:
        z_t = jnp.pad(z_t, ((0, 0), (0, n_pad - N)))
    grid = (n_pad // t,)

    out_shapes = (
        jax.ShapeDtypeStruct((e_dim, n_pad), jnp.float32),   # z_q transposed
        jax.ShapeDtypeStruct((1, n_pad), jnp.int32),         # argmin indices
        jax.ShapeDtypeStruct((1, n_pad), jnp.float32),       # per-column (z_q-z)^2 sum
    )

    vmem_limit = int(min(56 * 1024 * 1024,
                         max(32 * 1024 * 1024,
                             2 * _vmem_estimate_bytes(t, e_dim, n_e_pad))))

    zq_t, idx_row, sq_row = pl.pallas_call(
        _vq_kernel,
        out_shape=out_shapes,
        grid=grid,
        in_specs=[
            pl.BlockSpec((e_dim, t), lambda i: (0, i)),
            pl.BlockSpec((n_e_pad, e_dim), lambda i: (0, 0)),
            pl.BlockSpec((n_e_pad, 1), lambda i: (0, 0)),
        ],
        out_specs=(
            pl.BlockSpec((e_dim, t), lambda i: (0, i)),
            pl.BlockSpec((1, t), lambda i: (0, i)),
            pl.BlockSpec((1, t), lambda i: (0, i)),
        ),
        compiler_params=pltpu.CompilerParams(
            dimension_semantics=("parallel",),
            vmem_limit_bytes=vmem_limit,
        ),
    )(z_t, emb_p, e_sq_p)

    indices = idx_row[0, :N].astype(jnp.int32)[:, None]       # (N, 1)

    # loss = mean((sg[z_q]-z)^2) + beta*mean((z_q-sg[z])^2) == (1+beta)*mean(diff^2)
    sq_sum = jnp.sum(sq_row[0, :N])
    loss = (1.0 + beta) * sq_sum / jnp.float32(N * e_dim)

    # One-hot encodings / perplexity rebuilt in the wrapper (keeps the big
    # (N, n_e) array out of the kernel's HBM writes).
    min_encodings = jax.nn.one_hot(indices[:, 0], n_e, dtype=jnp.float32)
    e_mean = jnp.mean(min_encodings, axis=0)
    perplexity = jnp.exp(-jnp.sum(e_mean * jnp.log(e_mean + 1e-10)))

    # straight-through forward value is z_q; back to NCHW
    z_q = jnp.transpose(zq_t[:, :N].reshape(e_dim, B, H, W), (1, 0, 2, 3))

    return loss, z_q, perplexity, min_encodings, indices


def _reference(z, emb, beta=0.25):
    """Pure-JAX reference mirroring the PyTorch forward (for validation)."""
    B, C, H, W = z.shape
    zf = jnp.transpose(z, (0, 2, 3, 1)).reshape(-1, C)
    d = (jnp.sum(zf**2, axis=1, keepdims=True)
         + jnp.sum(emb**2, axis=1)
         - 2.0 * zf @ emb.T)
    idx = jnp.argmin(d, axis=1)
    enc = jax.nn.one_hot(idx, emb.shape[0], dtype=jnp.float32)
    zq = (enc @ emb).reshape(B, H, W, C)
    zr = jnp.transpose(z, (0, 2, 3, 1))
    loss = jnp.mean((zq - zr) ** 2) * (1.0 + beta)
    e_mean = jnp.mean(enc, axis=0)
    perp = jnp.exp(-jnp.sum(e_mean * jnp.log(e_mean + 1e-10)))
    return loss, jnp.transpose(zq, (0, 3, 1, 2)), perp, enc, idx[:, None]


if __name__ == "__main__":
    key = jax.random.PRNGKey(0)
    k_z, k_e = jax.random.split(key)

    B, C, H, W = 2, 4, 16, 16        # C == e_dim, N = B*H*W = 512
    n_e, e_dim, beta = 16, C, 0.25

    z = jax.random.normal(k_z, (B, C, H, W), dtype=jnp.float32)
    # nn.Embedding(n_e, e_dim).weight ~ U(-1/n_e, 1/n_e), deterministic init here
    emb = jax.random.uniform(k_e, (n_e, e_dim), dtype=jnp.float32,
                             minval=-1.0 / n_e, maxval=1.0 / n_e)

    loss, z_q, perplexity, min_encodings, min_indices = jax.block_until_ready(
        vector_quantizer(z, emb, beta=beta, tile=512))

    # lightweight correctness check against a pure-JAX reference
    r_loss, r_zq, r_perp, r_enc, r_idx = _reference(z, emb, beta=beta)
    assert jnp.allclose(loss, r_loss, atol=1e-5)
    assert jnp.allclose(z_q, r_zq, atol=1e-5)
    assert jnp.allclose(perplexity, r_perp, atol=1e-4)
    assert jnp.array_equal(min_encodings, r_enc)
    assert jnp.array_equal(min_indices.astype(jnp.int32), r_idx.astype(jnp.int32))

    print("KERNEL_OK")
</pallas_src>

<mosaic_0001>
module attributes {stable_mosaic.version = 11 : i64} {
  func.func @_vq_kernel(%arg0: i32, %arg1: memref<4x512xf32, #tpu.memory_space<vmem>>, %arg2: memref<16x4xf32, #tpu.memory_space<vmem>>, %arg3: memref<16x1xf32, #tpu.memory_space<vmem>>, %arg4: memref<4x512xf32, #tpu.memory_space<vmem>>, %arg5: memref<1x512xi32, #tpu.memory_space<vmem>>, %arg6: memref<1x512xf32, #tpu.memory_space<vmem>>) attributes {dimension_semantics = [#tpu.dimension_semantics<parallel>], iteration_bounds = array<i64: 1>, scalar_prefetch = 0 : i64, scratch_operands = 0 : i64, tpu.core_type = #tpu.core_type<tc>, window_params = [{transform_indices = @transform_0, window_bounds = array<i64: 4, 512>}, {pipeline_mode = #tpu.pipeline_mode<synchronous>, transform_indices = @transform_1, window_bounds = array<i64: 16, 4>}, {pipeline_mode = #tpu.pipeline_mode<synchronous>, transform_indices = @transform_2, window_bounds = array<i64: 16, 1>}, {transform_indices = @transform_3, window_bounds = array<i64: 4, 512>}, {transform_indices = @transform_4, window_bounds = array<i64: 1, 512>}, {transform_indices = @transform_5, window_bounds = array<i64: 1, 512>}]} {
    %c0 = arith.constant 0 : index
    %c0_0 = arith.constant 0 : index
    %0 = vector.load %arg1[%c0, %c0_0] : memref<4x512xf32, #tpu.memory_space<vmem>>, vector<4x512xf32>
    %c0_1 = arith.constant 0 : index
    %c0_2 = arith.constant 0 : index
    %1 = vector.load %arg2[%c0_1, %c0_2] : memref<16x4xf32, #tpu.memory_space<vmem>>, vector<16x4xf32>
    %cst = arith.constant dense<0.000000e+00> : vector<16x512xf32>
    %2 = tpu.matmul %1, %0, %cst {dimension_numbers = #tpu.dot_dimension_numbers<[1], [0], [0], [1], [0, 0, 1, 1], [], []>} : vector<16x4xf32>, vector<4x512xf32>, vector<16x512xf32> -> vector<16x512xf32>
    %c0_3 = arith.constant 0 : index
    %c0_4 = arith.constant 0 : index
    %3 = vector.load %arg3[%c0_3, %c0_4] : memref<16x1xf32, #tpu.memory_space<vmem>>, vector<16x1xf32>
    %cst_5 = arith.constant 2.000000e+00 : f32
    %4 = vector.broadcast %cst_5 : f32 to vector<16x512xf32>
    %5 = arith.mulf %4, %2 : vector<16x512xf32>
    %6 = vector.broadcast %3 : vector<16x1xf32> to vector<16x512xf32>
    %7 = arith.subf %6, %5 : vector<16x512xf32>
    %cst_6 = arith.constant dense<0x7F800000> : vector<512xf32>
    %8 = vector.multi_reduction <minimumf>, %7, %cst_6 [0] : vector<16x512xf32> to vector<512xf32>
    %9 = vector.shape_cast %8 : vector<512xf32> to vector<1x512xf32>
    %10 = tpu.iota {dimensions = array<i32: 0>} : vector<16x512xi32>
    %11 = vector.broadcast %9 : vector<1x512xf32> to vector<16x512xf32>
    %12 = arith.cmpf oeq, %7, %11 : vector<16x512xf32>
    %c16_i32 = arith.constant 16 : i32
    %13 = vector.broadcast %c16_i32 : i32 to vector<16x512xi32>
    %14 = arith.select %12, %10, %13 : vector<16x512xi1>, vector<16x512xi32>
    %cst_7 = arith.constant dense<2147483647> : vector<512xi32>
    %15 = vector.multi_reduction <minsi>, %14, %cst_7 [0] : vector<16x512xi32> to vector<512xi32>
    %16 = vector.shape_cast %15 : vector<512xi32> to vector<1x512xi32>
    %17 = vector.broadcast %16 : vector<1x512xi32> to vector<16x512xi32>
    %18 = arith.cmpi eq, %10, %17 : vector<16x512xi32>
    %19 = arith.extui %18 : vector<16x512xi1> to vector<16x512xi32>
    %20 = arith.sitofp %19 : vector<16x512xi32> to vector<16x512xf32>
    %cst_8 = arith.constant dense<0.000000e+00> : vector<4x512xf32>
    %21 = tpu.matmul %1, %20, %cst_8 {dimension_numbers = #tpu.dot_dimension_numbers<[0], [0], [1], [1], [0, 1, 1, 1], [], []>} : vector<16x4xf32>, vector<16x512xf32>, vector<4x512xf32> -> vector<4x512xf32>
    %22 = arith.subf %21, %0 : vector<4x512xf32>
    %c0_9 = arith.constant 0 : index
    %c0_10 = arith.constant 0 : index
    %23 = vector.load %arg4[%c0_9, %c0_10] : memref<4x512xf32, #tpu.memory_space<vmem>>, vector<4x512xf32>
    tpu.vector_store %arg4[%c0_9, %c0_10], %21 {strides = array<i32>} : memref<4x512xf32, #tpu.memory_space<vmem>>, vector<4x512xf32>,
    %c0_11 = arith.constant 0 : index
    %c0_12 = arith.constant 0 : index
    %24 = vector.load %arg5[%c0_11, %c0_12] : memref<1x512xi32, #tpu.memory_space<vmem>>, vector<1x512xi32>
    tpu.vector_store %arg5[%c0_11, %c0_12], %16 {strides = array<i32>} : memref<1x512xi32, #tpu.memory_space<vmem>>, vector<1x512xi32>,
    %25 = arith.mulf %22, %22 : vector<4x512xf32>
    %cst_13 = arith.constant dense<0.000000e+00> : vector<512xf32>
    %26 = vector.multi_reduction <add>, %25, %cst_13 [0] : vector<4x512xf32> to vector<512xf32>
    %27 = vector.shape_cast %26 : vector<512xf32> to vector<1x512xf32>
    %c0_14 = arith.constant 0 : index
    %c0_15 = arith.constant 0 : index
    %28 = vector.load %arg6[%c0_14, %c0_15] : memref<1x512xf32, #tpu.memory_space<vmem>>, vector<1x512xf32>
    tpu.vector_store %arg6[%c0_14, %c0_15], %27 {strides = array<i32>} : memref<1x512xf32, #tpu.memory_space<vmem>>, vector<1x512xf32>,
    return
  }
  func.func @transform_0(%arg0: i32) -> (i32, i32) {
    %c0_i32 = arith.constant 0 : i32
    %c0_i32_0 = arith.constant 0 : i32
    return %c0_i32, %arg0 : i32, i32
  }
  func.func @transform_1(%arg0: i32) -> (i32, i32) {
    %c0_i32 = arith.constant 0 : i32
    %c0_i32_0 = arith.constant 0 : i32
    %c0_i32_1 = arith.constant 0 : i32
    return %c0_i32, %c0_i32_0 : i32, i32
  }
  func.func @transform_2(%arg0: i32) -> (i32, i32) {
    %c0_i32 = arith.constant 0 : i32
    %c0_i32_0 = arith.constant 0 : i32
    %c0_i32_1 = arith.constant 0 : i32
    return %c0_i32, %c0_i32_0 : i32, i32
  }
  func.func @transform_3(%arg0: i32) -> (i32, i32) {
    %c0_i32 = arith.constant 0 : i32
    %c0_i32_0 = arith.constant 0 : i32
    return %c0_i32, %arg0 : i32, i32
  }
  func.func @transform_4(%arg0: i32) -> (i32, i32) {
    %c0_i32 = arith.constant 0 : i32
    %c0_i32_0 = arith.constant 0 : i32
    return %c0_i32, %arg0 : i32, i32
  }
  func.func @transform_5(%arg0: i32) -> (i32, i32) {
    %c0_i32 = arith.constant 0 : i32
    %c0_i32_0 = arith.constant 0 : i32
    return %c0_i32, %arg0 : i32, i32
  }
}

</mosaic_0001>

<bundles_post_ra>
// kernel: vector_quantizer.1
= control target key start
LH: loop header
LB: loop body
LE: loop exit
PB: predicated region body
PF: predicated region fallthrough
CT: control target
= control target key end

     0   :  { %v530_v3 = vmov 0   ;;  %vm37_vm0 = vcmask 1043456   ;;  %vm30_vm1 = vcmask 31744   ;;  %v194_v35 = vlaneseq  ;;  %s651_s0 = inlined_call_operand.vmem [shape: f32[4,512], index: 0, kind: input, shape index: {}]   ;;  %s652_s1 = inlined_call_operand.vmem [shape: f32[16,4], index: 1, kind: input, shape index: {}]   ;;  %s653_s2 = inlined_call_operand.vmem [shape: f32[16,1], index: 2, kind: input, shape index: {}]   ;;  %s654_s4 = inlined_call_operand.vmem [shape: s32[1,512], index: 4, kind: output, shape index: {1}]   ;;  %s655_s3 = inlined_call_operand.vmem [shape: f32[4,512], index: 3, kind: output, shape index: {0}]   ;;  %s656_s5 = inlined_call_operand.vmem [shape: f32[1,512], index: 5, kind: output, shape index: {2}]  }
   0x1   :  { %v17_v0 = vld [vmem:[%s651_s0] sm:$0xff]  ;;  %v18_v1 = vld [vmem:[%s651_s0 + $0x8] sm:$0xff]  ;;  %529 = vset.pattern.permute.xlu0 %v530_v3 }
   0x2   :  { %v19_v2 = vld [vmem:[%s652_s1] sm:$0xff]  ;;  %23 = vst [vmem:[#allocation1] ss:$2 sm:$0xff] %v17_v0  ;;  %v139_v9 = vld [vmem:[%s653_s2 + $0x8] sm:$0xff]  ;;  %v593_v46 = vshrl.u32 %v194_v35, 7 }
   0x3   :  { %v138_v4 = vld [vmem:[%s653_s2] sm:$0xff]  ;;  %281 = vxpose.xlu1.b32.start [1/2] (short) (narrow) %v19_v2, 8  ;;  %25 = vst [vmem:[#allocation1 + $0x10] ss:$2 sm:$0xff] %v18_v1  ;;  %v20_v10 = vld [vmem:[%s652_s1 + $0x8] sm:$0xff] }
   0x4   :  { %150 = vperm.xlu0 %529, %v138_v4   ;;  %v596_v55 = vadd.s32 8, %v593_v46 }
   0x9   :  { %v26_v5 = vld.sshfl [vmem:[#allocation1] sm:$0xff pattern:$0x75316420]  ;;  %v27_v6 = vld.sshfl [vmem:[#allocation1 + $0x8] sm:$0xff pattern:$0x75316420] }
   0xa   :  { %494 = vmatpush.msk.msra.mxu0 %vm37_vm0, %v26_v5  ;;  %497 = vmatpush.msk.msra.mxu1 %vm37_vm0, %v27_v6  ;;  %397 = vst [vmem:[#allocation1] ss:$2 sm:$0xff] %v17_v0  ;;  %v28_v7 = vld.sshfl [vmem:[#allocation1 + $0x10] sm:$0xff pattern:$0x75316420] }
   0xb   :  { %500 = vmatpush.msk.msra.mxu2 %vm37_vm0, %v28_v7  ;;  %v29_v8 = vld.sshfl [vmem:[#allocation1 + $0x18] sm:$0xff pattern:$0x75316420]  ;;  %495 = vmatmul.msk.f32.vlgmr.msra.gmra.mxu0 %vm30_vm1, %v19_v2 }
   0xc   :  { %503 = vmatpush.msk.msra.mxu3 %vm37_vm0, %v29_v8  ;;  %399 = vst [vmem:[#allocation1 + $0x10] ss:$2 sm:$0xff] %v18_v1  ;;  %498 = vmatmul.msk.f32.vlgmr.msra.gmra.mxu1 %vm30_vm1, %v19_v2 }
   0xd   :  { %501 = vmatmul.msk.f32.vlgmr.msra.gmra.mxu2 %vm30_vm1, %v19_v2  ;;  %504 = vmatmul.msk.f32.vlgmr.msra.gmra.mxu3 %vm30_vm1, %v19_v2 }
   0xe   :  { %155 = vperm.xlu0 %529, %v139_v9   ;;  %282 = vxpose.xlu1.b32.end [2/2] (short) (narrow) %v20_v10, 8 }
  0x13   :  { %496 = vmatmul.msk.f32.gmra.mxu0 %vm30_vm1, %v20_v10 }
  0x14   :  { %499 = vmatmul.msk.f32.gmra.mxu1 %vm30_vm1, %v20_v10 }
  0x15   :  { %502 = vmatmul.msk.f32.gmra.mxu2 %vm30_vm1, %v20_v10  ;;  %505 = vmatmul.msk.f32.gmra.mxu3 %vm30_vm1, %v20_v10 }
  0x76   :  { %v151_v12 = vpop.permute.xlu0 %150 }
  0x80   :  { %v156_v22 = vpop.permute.xlu0 %155 }
  0x88   :  { %v63_v11 = vpop.f32.mrf.mxu0 }
  0x89   :  { %v86_v13 = vpop.f32.mrf.mxu1  ;;  %v140_v14 = vmul.f32 2.0, %v63_v11 }
  0x8a   :  { %v141_v15 = vmul.f32 2.0, %v86_v13 }
  0x8b   :  { %v158_v23 = vsub.f32 %v151_v12, %v140_v14 }
  0x8c   :  { %v159_v24 = vsub.f32 %v151_v12, %v141_v15 }
  0x90   :  { %v109_v16 = vpop.f32.mrf.mxu2  ;;  %v132_v17 = vpop.f32.mrf.mxu3 }
  0x91   :  { %v66_v18 = vpop.f32.mrf.mxu0  ;;  %v89_v19 = vpop.f32.mrf.mxu1  ;;  %v142_v29 = vmul.f32 2.0, %v109_v16  ;;  %v143_v30 = vmul.f32 2.0, %v132_v17 }
  0x92   :  { %v144_v20 = vmul.f32 2.0, %v66_v18  ;;  %v145_v21 = vmul.f32 2.0, %v89_v19 }
  0x93   :  { %v160_v40 = vsub.f32 %v151_v12, %v142_v29  ;;  %v161_v41 = vsub.f32 %v151_v12, %v143_v30 }
  0x94   :  { %v162_v25 = vsub.f32 %v156_v22, %v144_v20  ;;  %v163_v26 = vsub.f32 %v156_v22, %v145_v21 }
  0x96   :  { %v166_v27 = vmin.f32 %v158_v23, %v162_v25  ;;  %v173_v28 = vmin.f32 %v159_v24, %v163_v26 }
  0x98   :  { %v167_v31 = vrot.slane %v166_v27, 4  ;;  %v174_v32 = vrot.slane %v173_v28, 4  ;;  %v112_v33 = vpop.f32.mrf.mxu2  ;;  %v135_v34 = vpop.f32.mrf.mxu3 }
  0x99   :  { %v146_v36 = vmul.f32 2.0, %v112_v33  ;;  %v147_v37 = vmul.f32 2.0, %v135_v34  ;;  %v531_v34 = vmov 1.0  }
  0x9a   :  { %v168_v38 = vmin.f32 %v166_v27, %v167_v31  ;;  %v175_v39 = vmin.f32 %v173_v28, %v174_v32 }
  0x9b   :  { %v164_v42 = vsub.f32 %v156_v22, %v146_v36  ;;  %v165_v43 = vsub.f32 %v156_v22, %v147_v37 }
  0x9c   :  { %v169_v44 = vrot.slane %v168_v38, 2  ;;  %v176_v45 = vrot.slane %v175_v39, 2 }
  0x9d   :  { %v180_v47 = vmin.f32 %v160_v40, %v164_v42  ;;  %v187_v48 = vmin.f32 %v161_v41, %v165_v43 }
  0x9e   :  { %v170_v49 = vmin.f32 %v168_v38, %v169_v44  ;;  %v177_v50 = vmin.f32 %v175_v39, %v176_v45 }
  0x9f   :  { %v181_v51 = vrot.slane %v180_v47, 4  ;;  %v188_v52 = vrot.slane %v187_v48, 4 }
  0xa0   :  { %v171_v53 = vrot.slane %v170_v49, 1  ;;  %v178_v54 = vrot.slane %v177_v50, 1 }
  0xa1   :  { %v182_v56 = vmin.f32 %v180_v47, %v181_v51  ;;  %v189_v57 = vmin.f32 %v187_v48, %v188_v52  ;;  %v400_v51 = vld.sshfl [vmem:[#allocation1] sm:$0xff pattern:$0x75316420] }
  0xa2   :  { %v172_v58 = vmin.f32 %v170_v49, %v171_v53  ;;  %v179_v59 = vmin.f32 %v177_v50, %v178_v54 }
  0xa3   :  { %v183_v60 = vrot.slane %v182_v56, 2  ;;  %v190_v61 = vrot.slane %v189_v57, 2 }
  0xa4   :  { %vm197_vm2 = vcmp.eq.f32.partialorder %v158_v23, %v172_v58  ;;  %vm201_vm3 = vcmp.eq.f32.partialorder %v162_v25, %v172_v58  ;;  %vm198_vm4 = vcmp.eq.f32.partialorder %v159_v24, %v179_v59  ;;  %vm202_vm5 = vcmp.eq.f32.partialorder %v163_v26, %v179_v59 }
  0xa5   :  { %v205_v62 = vsel %vm197_vm2, %v593_v46, 16  ;;  %v209_v63 = vsel %vm201_vm3, %v596_v55, 16  ;;  %v206_v0 = vsel %vm198_vm4, %v593_v46, 16  ;;  %v210_v1 = vsel %vm202_vm5, %v596_v55, 16 }
  0xa6   :  { %vm213_vm6 = vcmp.lt.s32.totalorder %v205_v62, %v209_v63  ;;  %vm224_vm7 = vcmp.lt.s32.totalorder %v206_v0, %v210_v1  ;;  %v184_v2 = vmin.f32 %v182_v56, %v183_v60  ;;  %v191_v3 = vmin.f32 %v189_v57, %v190_v61 }
  0xa7   :  { %v214_v4 = vsel %vm213_vm6, %v205_v62, %v209_v63  ;;  %v225_v5 = vsel %vm224_vm7, %v206_v0, %v210_v1  ;;  %v402_v63 = vld.sshfl [vmem:[#allocation1 + $0x10] sm:$0xff pattern:$0x75316420]  ;;  %v403_v0 = vld.sshfl [vmem:[#allocation1 + $0x18] sm:$0xff pattern:$0x75316420] }
  0xa8   :  { %v215_v6 = vrot.slane %v214_v4, 4  ;;  %v226_v7 = vrot.slane %v225_v5, 4  ;;  %v185_v8 = vrot.slane %v184_v2, 1  ;;  %v192_v9 = vrot.slane %v191_v3, 1 }
  0xaa   :  { %vm216_vm8 = vcmp.lt.s32.totalorder %v214_v4, %v215_v6  ;;  %vm227_vm9 = vcmp.lt.s32.totalorder %v225_v5, %v226_v7  ;;  %v186_v10 = vmin.f32 %v184_v2, %v185_v8  ;;  %v193_v11 = vmin.f32 %v191_v3, %v192_v9  ;;  %v297_v36 = vpop.trf.xlu1 }
  0xab   :  { %v217_v12 = vsel %vm216_vm8, %v214_v4, %v215_v6  ;;  %v228_v13 = vsel %vm227_vm9, %v225_v5, %v226_v7 }
  0xac   :  { %vm199_vm10 = vcmp.eq.f32.partialorder %v160_v40, %v186_v10  ;;  %vm203_vm11 = vcmp.eq.f32.partialorder %v164_v42, %v186_v10  ;;  %vm200_vm12 = vcmp.eq.f32.partialorder %v161_v41, %v193_v11  ;;  %vm204_vm13 = vcmp.eq.f32.partialorder %v165_v43, %v193_v11 }
  0xad   :  { %v207_v14 = vsel %vm199_vm10, %v593_v46, 16  ;;  %v211_v15 = vsel %vm203_vm11, %v596_v55, 16  ;;  %v208_v16 = vsel %vm200_vm12, %v593_v46, 16  ;;  %v212_v17 = vsel %vm204_vm13, %v596_v55, 16 }
  0xae   :  { %vm235_vm14 = vcmp.lt.s32.totalorder %v207_v14, %v211_v15  ;;  %vm246_vm15 = vcmp.lt.s32.totalorder %v208_v16, %v212_v17  ;;  %v218_v18 = vrot.slane %v217_v12, 2  ;;  %v229_v19 = vrot.slane %v228_v13, 2 }
  0xaf   :  { %v236_v20 = vsel %vm235_vm14, %v207_v14, %v211_v15  ;;  %v247_v21 = vsel %vm246_vm15, %v208_v16, %v212_v17  ;;  %vm313_vm11 = vcmask 130048   ;;  %vm427_vm14 = vcmask 1040384  }
  0xb0   :  { %v237_v22 = vrot.slane %v236_v20, 4  ;;  %v248_v23 = vrot.slane %v247_v21, 4  ;;  %vm219_vm1 = vcmp.lt.s32.totalorder %v217_v12, %v218_v18  ;;  %vm230_vm2 = vcmp.lt.s32.totalorder %v228_v13, %v229_v19 }
  0xb1   :  { %v220_v24 = vsel %vm219_vm1, %v217_v12, %v218_v18  ;;  %v231_v25 = vsel %vm230_vm2, %v228_v13, %v229_v19  ;;  %vm429_vm2 = vcmask 1042434  }
  0xb2   :  { %vm238_vm3 = vcmp.lt.s32.totalorder %v236_v20, %v237_v22  ;;  %vm249_vm4 = vcmp.lt.s32.totalorder %v247_v21, %v248_v23  ;;  %v221_v26 = vrot.slane %v220_v24, 1  ;;  %v232_v27 = vrot.slane %v231_v25, 1 }
  0xb3   :  { %v239_v28 = vsel %vm238_vm3, %v236_v20, %v237_v22  ;;  %v250_v29 = vsel %vm249_vm4, %v247_v21, %v248_v23  ;;  %vm431_vm3 = vcmask 1041408  }
  0xb4   :  { %vm222_vm5 = vcmp.lt.s32.totalorder %v220_v24, %v221_v26  ;;  %vm233_vm6 = vcmp.lt.s32.totalorder %v231_v25, %v232_v27  ;;  %v240_v30 = vrot.slane %v239_v28, 2  ;;  %v251_v31 = vrot.slane %v250_v29, 2 }
  0xb5   :  { %v223_v32 = vsel %vm222_vm5, %v220_v24, %v221_v26  ;;  %v234_v33 = vsel %vm233_vm6, %v231_v25, %v232_v27  ;;  %vm615_vm6 = vcmp.lt.s32.totalorder %v194_v35, 512  ;;  %v401_v35 = vld.sshfl [vmem:[#allocation1 + $0x8] sm:$0xff pattern:$0x75316420] }
  0xb6   :  { %vm261_vm7 = vcmp.eq.s32.totalorder %v596_v55, %v223_v32  ;;  %vm262_vm8 = vcmp.eq.s32.totalorder %v596_v55, %v234_v33  ;;  %vm241_vm9 = vcmp.lt.s32.totalorder %v239_v28, %v240_v30  ;;  %vm252_vm10 = vcmp.lt.s32.totalorder %v250_v29, %v251_v31 }
  0xb7   :  { %514 = vmatpush.msk.msrb.mxu0 %vm261_vm7, %v531_v34  ;;  %517 = vmatpush.msk.msrb.mxu1 %vm262_vm8, %v531_v34  ;;  %vm257_vm12 = vcmp.eq.s32.totalorder %v593_v46, %v223_v32  ;;  %vm258_vm13 = vcmp.eq.s32.totalorder %v593_v46, %v234_v33  ;;  %v242_v37 = vsel %vm241_vm9, %v239_v28, %v240_v30  ;;  %v424_v41 = vrot.slane %v234_v33, 7 }
  0xb8   :  { %v253_v38 = vsel %vm252_vm10, %v250_v29, %v251_v31  ;;  %v243_v39 = vrot.slane %v242_v37, 1 }
  0xb9   :  { %515 = vmatpush.msk.msrb.mxu0 %vm257_vm12, %v531_v34  ;;  %518 = vmatpush.msk.msrb.mxu1 %vm258_vm13, %v531_v34  ;;  %v254_v40 = vrot.slane %v253_v38, 1  ;;  %v428_v48 = vsel %vm427_vm14, %v223_v32, %v424_v41 }
  0xba   :  { %519 = vmatmul.msk.f32.vlgmr.msrb.gmra.mxu1 %vm313_vm11, %v297_v36  ;;  %516 = vmatmul.msk.f32.vlgmr.msrb.gmra.mxu0 %vm313_vm11, %v297_v36  ;;  %vm244_vm15 = vcmp.lt.s32.totalorder %v242_v37, %v243_v39 }
  0xbb   :  { %vm255_vm1 = vcmp.lt.s32.totalorder %v253_v38, %v254_v40  ;;  %v245_v42 = vsel %vm244_vm15, %v242_v37, %v243_v39 }
  0xbc   :  { %v256_v43 = vsel %vm255_vm1, %v253_v38, %v254_v40  ;;  %vm263_vm4 = vcmp.eq.s32.totalorder %v596_v55, %v245_v42  ;;  %v425_v44 = vrot.slane %v245_v42, 6  ;;  %vm259_vm7 = vcmp.eq.s32.totalorder %v593_v46, %v245_v42 }
  0xbd   :  { %vm264_vm5 = vcmp.eq.s32.totalorder %v596_v55, %v256_v43  ;;  %v426_v45 = vrot.slane %v256_v43, 5  ;;  %520 = vmatpush.msk.msrb.mxu2 %vm263_vm4, %v531_v34  ;;  %vm260_vm8 = vcmp.eq.s32.totalorder %v593_v46, %v256_v43 }
  0xbe   :  { %523 = vmatpush.msk.msrb.mxu3 %vm264_vm5, %v531_v34 }
  0xbf   :  { %v430_v49 = vsel %vm429_vm2, %v425_v44, %v426_v45  ;;  %521 = vmatpush.msk.msrb.mxu2 %vm259_vm7, %v531_v34 }
  0xc0   :  { %v432_v50 = vsel %vm431_vm3, %v428_v48, %v430_v49  ;;  %524 = vmatpush.msk.msrb.mxu3 %vm260_vm8, %v531_v34  ;;  %522 = vmatmul.msk.f32.vlgmr.msrb.gmra.mxu2 %vm313_vm11, %v297_v36 }
  0xc1   :  { %437 = vst.msk [vmem:[%s654_s4] sm:$0xf] %vm615_vm6, %v432_v50  ;;  %525 = vmatmul.msk.f32.vlgmr.msrb.gmra.mxu3 %vm313_vm11, %v297_v36 }
 0x137   :  { %v354_v52 = vpop.f32.mrf.mxu1  ;;  %v334_v53 = vpop.f32.mrf.mxu0 }
 0x138   :  { %v409_v54 = vsub.f32 %v354_v52, %v401_v35  ;;  %v416_v46 = vrot.slane %v354_v52, 4  ;;  %v408_v55 = vsub.f32 %v334_v53, %v400_v51 }
 0x13a   :  { %v439_v56 = vmul.f32 %v409_v54, %v409_v54  ;;  %v418_v57 = vsel %vm37_vm0, %v334_v53, %v416_v46  ;;  %v438_v58 = vmul.f32 %v408_v55, %v408_v55 }
 0x13b   :  { %422 = vst [vmem:[%s655_s3] sm:$0xff] %v418_v57 }
 0x13c   :  { %v449_v59 = vsel %vm37_vm0, %v439_v56, 0.0  ;;  %v442_v61 = vsel %vm37_vm0, %v438_v58, 0.0 }
 0x13d   :  { %v450_v60 = vrot.slane %v449_v59, 4  ;;  %v443_v1 = vrot.slane %v442_v61, 4 }
 0x13f   :  { %v451_v62 = vadd.f32 %v450_v60, %v449_v59  ;;  %v444_v8 = vadd.f32 %v443_v1, %v442_v61 }
 0x141   :  { %v452_v2 = vrot.slane %v451_v62, 2  ;;  %v445_v17 = vrot.slane %v444_v8, 2 }
 0x143   :  { %v374_v3 = vpop.f32.mrf.mxu2  ;;  %v453_v12 = vadd.f32 %v452_v2, %v451_v62  ;;  %v446_v23 = vadd.f32 %v445_v17, %v444_v8 }
 0x144   :  { %v394_v4 = vpop.f32.mrf.mxu3  ;;  %v410_v5 = vsub.f32 %v374_v3, %v402_v63 }
 0x145   :  { %v411_v6 = vsub.f32 %v394_v4, %v403_v0  ;;  %v417_v7 = vrot.slane %v394_v4, 4  ;;  %v454_v18 = vrot.slane %v453_v12, 1  ;;  %v447_v29 = vrot.slane %v446_v23, 1 }
 0x146   :  { %v440_v9 = vmul.f32 %v410_v5, %v410_v5 }
 0x147   :  { %v419_v10 = vsel %vm37_vm0, %v374_v3, %v417_v7  ;;  %v441_v11 = vmul.f32 %v411_v6, %v411_v6  ;;  %v455_v24 = vadd.f32 %v454_v18, %v453_v12  ;;  %v448_v36 = vadd.f32 %v447_v29, %v446_v23 }
 0x148   :  { %423 = vst [vmem:[%s655_s3 + $0x8] sm:$0xff] %v419_v10  ;;  %v456_v13 = vsel %vm37_vm0, %v440_v9, 0.0 }
 0x149   :  { %v463_v14 = vsel %vm37_vm0, %v441_v11, 0.0  ;;  %v457_v15 = vrot.slane %v456_v13, 4  ;;  %v474_v30 = vrot.slane %v455_v24, 7 }
 0x14a   :  { %v464_v16 = vrot.slane %v463_v14, 4 }
 0x14b   :  { %v458_v19 = vadd.f32 %v457_v15, %v456_v13  ;;  %v477_v38 = vsel %vm427_vm14, %v448_v36, %v474_v30 }
 0x14c   :  { %v465_v20 = vadd.f32 %v464_v16, %v463_v14 }
 0x14d   :  { %v459_v21 = vrot.slane %v458_v19, 2 }
 0x14e   :  { %v466_v22 = vrot.slane %v465_v20, 2 }
 0x14f   :  { %v460_v25 = vadd.f32 %v459_v21, %v458_v19 }
 0x150   :  { %v467_v26 = vadd.f32 %v466_v22, %v465_v20 }
 0x151   :  { %v461_v27 = vrot.slane %v460_v25, 1 }
 0x152   :  { %v468_v28 = vrot.slane %v467_v26, 1 }
 0x153   :  { %v462_v31 = vadd.f32 %v461_v27, %v460_v25 }
 0x154   :  { %v469_v32 = vadd.f32 %v468_v28, %v467_v26 }
 0x155   :  { %v475_v33 = vrot.slane %v462_v31, 6 }
 0x156   :  { %v476_v34 = vrot.slane %v469_v32, 5 }
 0x158   :  { %v478_v37 = vsel %vm429_vm2, %v475_v33, %v476_v34 }
 0x159   :  { %v479_v39 = vsel %vm431_vm3, %v477_v38, %v478_v37 }
 0x15a   :  { %481 = vst.msk [vmem:[%s656_s5] sm:$0xf] %vm615_vm6, %v479_v39 }

</bundles_post_ra>
